<compile_context>
chip_gen: v5e
topology: v5e:2x2
jax: 0.10.0
libtpu: 0.0.40
codegen_flags: <defaults>
</compile_context>

<pallas_src>
import functools

import numpy as np
import jax
import jax.numpy as jnp
from jax import lax
from jax.experimental import pallas as pl
from jax.experimental.pallas import tpu as pltpu


# --------------------------------------------------------------------------
# Pallas kernel: 3 fused matmuls (biases folded in via a ones column).
# --------------------------------------------------------------------------
def decoder_kernel(z_ref, w2_ref, wc2_ref, wc3_ref, out_ref):
    # x_aug = relu(z_aug @ W2a)   -> (TB, 21), last column is the constant 1
    x = jnp.maximum(
        jnp.dot(z_ref[...], w2_ref[...], preferred_element_type=jnp.float32), 0.0)
    # TODO(synk): Dropout(0.3) is treated as identity (eval-mode semantics).
    # xc_aug = relu(x_aug @ Wc2a) -> (TB, 160+20+1): [s_flat | lh | 1]
    xc = jnp.maximum(
        jnp.dot(x, wc2_ref[...], preferred_element_type=jnp.float32), 0.0)
    # out = tanh(xc_aug @ Wc3a)   -> (TB, n_out_pad): [s | l | zero padding]
    out_ref[...] = jnp.tanh(
        jnp.dot(xc, wc3_ref[...], preferred_element_type=jnp.float32))


# --------------------------------------------------------------------------
# One-time host-side parameter preparation (runs OUTSIDE jit).
# --------------------------------------------------------------------------
def _build_deconv_matmul(wt, bc, h, channels):
    """ConvTranspose2d(10->channels, k=2, stride=1, padding=1) as a matmul.

    out[b, co, oy, ox] = bias[co]
        + sum_{ci,ky,kx} in[b, ci, oy+1-ky, ox+1-kx] * wt[ci, co, ky, kx]
    Input flattened as  ci*h*h + iy*h + ix  (NCHW unflatten of linear1 output).
    Output flattened as co*Ho*Wo + oy*Wo + ox.
    """
    ci_n = wt.shape[0]
    Ho = Wo = h - 1
    M = np.zeros((ci_n * h * h, channels * Ho * Wo), np.float32)
    for ci in range(ci_n):
        for co in range(channels):
            for ky in range(2):
                for kx in range(2):
                    w = wt[ci, co, ky, kx]
                    dy, dx = 1 - ky, 1 - kx
                    for oy in range(Ho):
                        for ox in range(Wo):
                            iy, ix = oy + dy, ox + dx
                            M[ci * h * h + iy * h + ix,
                              co * Ho * Wo + oy * Wo + ox] += w
    b_flat = np.repeat(bc.astype(np.float32), Ho * Wo)  # (channels*Ho*Wo,)
    return M, b_flat


def make_kernel_params(params, latent_dims, distance, channels):
    """Fold/fuse all weights into 3 matrices (bias folded via ones column)."""
    h = int(0.5 * (distance + 3))
    Ho = Wo = h - 1
    n1 = 10 * h * h                     # linear1 output width
    n_s = channels * Ho * Wo            # flattened s head width
    n_l = 4 * distance                  # l head width
    n_out = n_s + n_l
    n_out_pad = ((n_out + 127) // 128) * 128  # lane-dense output slab

    def np_(a):
        return np.asarray(jax.device_get(a), np.float32)

    w2, b2 = np_(params["linear2"][0]), np_(params["linear2"][1])
    w1, b1 = np_(params["linear1"][0]), np_(params["linear1"][1])
    wl2, bl2 = np_(params["linear_log_2"][0]), np_(params["linear_log_2"][1])
    wl1, bl1 = np_(params["linear_log_1"][0]), np_(params["linear_log_1"][1])
    wt, bc = np_(params["deconv"][0]), np_(params["deconv"][1])

    M, bM = _build_deconv_matmul(wt, bc, h, channels)   # (n1, n_s), (n_s,)

    L = latent_dims

    # Stage 1: z_aug(B, L+1) @ W2a(L+1, 21) ; col 20 is the carried constant 1.
    w2a = np.zeros((L + 1, 21), np.float32)
    w2a[:L, :20] = w2.T
    w2a[L, :20] = b2
    w2a[L, 20] = 1.0

    # Stage 2: x_aug(B,21) @ Wc2a(21, n1+21) -> [s_flat | lh | 1].
    wc2a = np.zeros((21, n1 + 21), np.float32)
    wc2a[:20, :n1] = w1.T
    wc2a[20, :n1] = b1
    wc2a[:20, n1:n1 + 20] = wl2.T
    wc2a[20, n1:n1 + 20] = bl2
    wc2a[20, n1 + 20] = 1.0

    # Stage 3: block-diagonal [deconv-matmul ; linear_log_1] with folded biases,
    # output padded to a multiple of 128 lanes.
    wc3a = np.zeros((n1 + 21, n_out_pad), np.float32)
    wc3a[:n1, :n_s] = M
    wc3a[n1 + 20, :n_s] = bM
    wc3a[n1:n1 + 20, n_s:n_s + n_l] = wl1.T
    wc3a[n1 + 20, n_s:n_s + n_l] = bl1

    return {
        "w2a": jnp.asarray(w2a),
        "wc2a": jnp.asarray(wc2a),
        "wc3a": jnp.asarray(wc3a),
    }


# --------------------------------------------------------------------------
# Jitted forward wrapper.
# --------------------------------------------------------------------------
@functools.partial(jax.jit, static_argnames=("distance", "channels"))
def decoder_simple_forward(z, kparams, distance, channels):
    h = int(0.5 * (distance + 3))
    Ho = Wo = h - 1
    n_s = channels * Ho * Wo
    n_l = 4 * distance

    w2a, wc2a, wc3a = kparams["w2a"], kparams["wc2a"], kparams["wc3a"]
    B, L = z.shape
    n_out_pad = wc3a.shape[1]

    # Capped batch tile (multiple of 8); pad batch so no rows are dropped.
    TB = min(512, ((B + 7) // 8) * 8)
    Bp = ((B + TB - 1) // TB) * TB

    z_aug = jnp.concatenate(
        [z.astype(jnp.float32), jnp.ones((B, 1), jnp.float32)], axis=1)
    if Bp != B:
        z_aug = jnp.pad(z_aug, ((0, Bp - B), (0, 0)))

    out = pl.pallas_call(
        decoder_kernel,
        out_shape=jax.ShapeDtypeStruct((Bp, n_out_pad), jnp.float32),
        grid=(Bp // TB,),
        in_specs=[
            pl.BlockSpec((TB, L + 1), lambda i: (i, 0)),     # z_aug (tiled)
            pl.BlockSpec(w2a.shape, lambda i: (0, 0)),       # weights stay
            pl.BlockSpec(wc2a.shape, lambda i: (0, 0)),      # VMEM-resident
            pl.BlockSpec(wc3a.shape, lambda i: (0, 0)),      # across steps
        ],
        out_specs=pl.BlockSpec((TB, n_out_pad), lambda i: (i, 0)),
        compiler_params=pltpu.CompilerParams(
            dimension_semantics=("parallel",)),
    )(z_aug, w2a, wc2a, wc3a)

    out = out[:B]
    s = out[:, :n_s].reshape(B, channels, Ho, Wo)   # NCHW, same as PyTorch
    l = out[:, n_s:n_s + n_l]
    return s, l


# --------------------------------------------------------------------------
# Random parameter construction (PyTorch-style init) + pure-JAX reference.
# --------------------------------------------------------------------------
def make_params(key, latent_dims, distance, channels):
    h = int(0.5 * (distance + 3))

    def lin(k, out_f, in_f):
        k1, k2 = jax.random.split(k)
        bound = 1.0 / np.sqrt(in_f)
        w = jax.random.uniform(k1, (out_f, in_f), jnp.float32, -bound, bound)
        b = jax.random.uniform(k2, (out_f,), jnp.float32, -bound, bound)
        return w, b

    keys = jax.random.split(key, 6)
    params = {
        "linear2": lin(keys[0], 20, latent_dims),
        "linear_log_2": lin(keys[1], 20, 20),
        "linear_log_1": lin(keys[2], 4 * distance, 20),
        "linear1": lin(keys[3], 10 * h * h, 20),
    }
    bound = 1.0 / np.sqrt(10 * 2 * 2)
    wt = jax.random.uniform(keys[4], (10, channels, 2, 2), jnp.float32, -bound, bound)
    bc = jax.random.uniform(keys[5], (channels,), jnp.float32, -bound, bound)
    params["deconv"] = (wt, bc)
    return params


def decoder_simple_reference(z, params, distance, channels):
    """Pure-JAX reference mirroring the PyTorch forward (eval mode)."""
    h = int(0.5 * (distance + 3))
    w2, b2 = params["linear2"]
    w1, b1 = params["linear1"]
    wl2, bl2 = params["linear_log_2"]
    wl1, bl1 = params["linear_log_1"]
    wt, bc = params["deconv"]

    x = jax.nn.relu(z @ w2.T + b2)
    s_flat = jax.nn.relu(x @ w1.T + b1)
    s_in = s_flat.reshape(z.shape[0], 10, h, h)
    # ConvTranspose2d(k=2,s=1,p=1) == VALID conv with flipped kernel
    w_conv = jnp.transpose(wt, (1, 0, 2, 3))[:, :, ::-1, ::-1]
    s_conv = lax.conv_general_dilated(
        s_in, w_conv, window_strides=(1, 1), padding="VALID",
        dimension_numbers=("NCHW", "OIHW", "NCHW")) + bc[None, :, None, None]
    s = jnp.tanh(s_conv)
    l = jnp.tanh(jax.nn.relu(x @ wl2.T + bl2) @ wl1.T + bl1)
    return s, l


if __name__ == "__main__":
    latent_dims, distance, channels, batch = 16, 5, 4, 8

    root = jax.random.PRNGKey(0)
    kz, kp = jax.random.split(root)
    z = jax.random.normal(kz, (batch, latent_dims), jnp.float32)
    params = make_params(kp, latent_dims, distance, channels)

    # One-time host-side fusion of the weights (outside jit).
    kparams = make_kernel_params(params, latent_dims, distance, channels)

    s, l = decoder_simple_forward(z, kparams, distance, channels)
    jax.block_until_ready((s, l))

    h = int(0.5 * (distance + 3))
    assert s.shape == (batch, channels, h - 1, h - 1), s.shape
    assert l.shape == (batch, 4 * distance), l.shape

    s_ref, l_ref = decoder_simple_reference(z, params, distance, channels)
    np.testing.assert_allclose(np.asarray(s), np.asarray(s_ref), rtol=1e-4, atol=1e-5)
    np.testing.assert_allclose(np.asarray(l), np.asarray(l_ref), rtol=1e-4, atol=1e-5)

    print("KERNEL_OK")
</pallas_src>

<mosaic_0001>
module attributes {stable_mosaic.version = 11 : i64} {
  func.func @decoder_kernel(%arg0: i32, %arg1: memref<8x17xf32, #tpu.memory_space<vmem>>, %arg2: memref<17x21xf32, #tpu.memory_space<vmem>>, %arg3: memref<21x181xf32, #tpu.memory_space<vmem>>, %arg4: memref<181x128xf32, #tpu.memory_space<vmem>>, %arg5: memref<8x128xf32, #tpu.memory_space<vmem>>) attributes {dimension_semantics = [#tpu.dimension_semantics<parallel>], iteration_bounds = array<i64: 1>, scalar_prefetch = 0 : i64, scratch_operands = 0 : i64, tpu.core_type = #tpu.core_type<tc>, window_params = [{transform_indices = @transform_0, window_bounds = array<i64: 8, 17>}, {pipeline_mode = #tpu.pipeline_mode<synchronous>, transform_indices = @transform_1, window_bounds = array<i64: 17, 21>}, {pipeline_mode = #tpu.pipeline_mode<synchronous>, transform_indices = @transform_2, window_bounds = array<i64: 21, 181>}, {pipeline_mode = #tpu.pipeline_mode<synchronous>, transform_indices = @transform_3, window_bounds = array<i64: 181, 128>}, {transform_indices = @transform_4, window_bounds = array<i64: 8, 128>}]} {
    %c0 = arith.constant 0 : index
    %c0_0 = arith.constant 0 : index
    %0 = vector.load %arg1[%c0, %c0_0] : memref<8x17xf32, #tpu.memory_space<vmem>>, vector<8x17xf32>
    %c0_1 = arith.constant 0 : index
    %c0_2 = arith.constant 0 : index
    %1 = vector.load %arg2[%c0_1, %c0_2] : memref<17x21xf32, #tpu.memory_space<vmem>>, vector<17x21xf32>
    %cst = arith.constant dense<0.000000e+00> : vector<8x21xf32>
    %2 = tpu.matmul %0, %1, %cst {dimension_numbers = #tpu.dot_dimension_numbers<[1], [0], [0], [1], [0, 0, 1, 1], [], []>} : vector<8x17xf32>, vector<17x21xf32>, vector<8x21xf32> -> vector<8x21xf32>
    %cst_3 = arith.constant 0.000000e+00 : f32
    %3 = vector.broadcast %cst_3 : f32 to vector<8x21xf32>
    %4 = arith.maximumf %2, %3 : vector<8x21xf32>
    %c0_4 = arith.constant 0 : index
    %c0_5 = arith.constant 0 : index
    %5 = vector.load %arg3[%c0_4, %c0_5] : memref<21x181xf32, #tpu.memory_space<vmem>>, vector<21x181xf32>
    %cst_6 = arith.constant dense<0.000000e+00> : vector<8x181xf32>
    %6 = tpu.matmul %4, %5, %cst_6 {dimension_numbers = #tpu.dot_dimension_numbers<[1], [0], [0], [1], [0, 0, 1, 1], [], []>} : vector<8x21xf32>, vector<21x181xf32>, vector<8x181xf32> -> vector<8x181xf32>
    %cst_7 = arith.constant 0.000000e+00 : f32
    %7 = vector.broadcast %cst_7 : f32 to vector<8x181xf32>
    %8 = arith.maximumf %6, %7 : vector<8x181xf32>
    %c0_8 = arith.constant 0 : index
    %c0_9 = arith.constant 0 : index
    %9 = vector.load %arg4[%c0_8, %c0_9] : memref<181x128xf32, #tpu.memory_space<vmem>>, vector<181x128xf32>
    %cst_10 = arith.constant dense<0.000000e+00> : vector<8x128xf32>
    %10 = tpu.matmul %8, %9, %cst_10 {dimension_numbers = #tpu.dot_dimension_numbers<[1], [0], [0], [1], [0, 0, 1, 1], [], []>} : vector<8x181xf32>, vector<181x128xf32>, vector<8x128xf32> -> vector<8x128xf32>
    %11 = math.tanh %10 : vector<8x128xf32>
    %c0_11 = arith.constant 0 : index
    %c0_12 = arith.constant 0 : index
    %12 = vector.load %arg5[%c0_11, %c0_12] : memref<8x128xf32, #tpu.memory_space<vmem>>, vector<8x128xf32>
    tpu.vector_store %arg5[%c0_11, %c0_12], %11 {strides = array<i32>} : memref<8x128xf32, #tpu.memory_space<vmem>>, vector<8x128xf32>,
    return
  }
  func.func @transform_0(%arg0: i32) -> (i32, i32) {
    %c0_i32 = arith.constant 0 : i32
    %c0_i32_0 = arith.constant 0 : i32
    return %arg0, %c0_i32 : i32, i32
  }
  func.func @transform_1(%arg0: i32) -> (i32, i32) {
    %c0_i32 = arith.constant 0 : i32
    %c0_i32_0 = arith.constant 0 : i32
    %c0_i32_1 = arith.constant 0 : i32
    return %c0_i32, %c0_i32_0 : i32, i32
  }
  func.func @transform_2(%arg0: i32) -> (i32, i32) {
    %c0_i32 = arith.constant 0 : i32
    %c0_i32_0 = arith.constant 0 : i32
    %c0_i32_1 = arith.constant 0 : i32
    return %c0_i32, %c0_i32_0 : i32, i32
  }
  func.func @transform_3(%arg0: i32) -> (i32, i32) {
    %c0_i32 = arith.constant 0 : i32
    %c0_i32_0 = arith.constant 0 : i32
    %c0_i32_1 = arith.constant 0 : i32
    return %c0_i32, %c0_i32_0 : i32, i32
  }
  func.func @transform_4(%arg0: i32) -> (i32, i32) {
    %c0_i32 = arith.constant 0 : i32
    %c0_i32_0 = arith.constant 0 : i32
    return %arg0, %c0_i32 : i32, i32
  }
}

</mosaic_0001>

<bundles_post_ra>
// kernel: decoder_simple_forward.1
= control target key start
LH: loop header
LB: loop body
LE: loop exit
PB: predicated region body
PF: predicated region fallthrough
CT: control target
= control target key end

     0   :  { %9 = vsyncpa [#allocation3], 0  ;;  %s377_s0 = inlined_call_operand.vmem [shape: f32[8,17], index: 0, kind: input, shape index: {}]   ;;  %s378_s1 = inlined_call_operand.hbm [shape: f32[17,21], index: 1, kind: input, shape index: {}]   ;;  %s379_s2 = inlined_call_operand.hbm [shape: f32[21,181], index: 2, kind: input, shape index: {}]   ;;  %s380_s3 = inlined_call_operand.hbm [shape: f32[181,128], index: 3, kind: input, shape index: {}]   ;;  %s381_s4 = inlined_call_operand.vmem [shape: f32[8,128], index: 4, kind: output, shape index: {}]  }
   0x1   :  { %10 = vsyncpa [#allocation5], 0  ;;  %s30_s17 = sshll.u32 %s379_s2, 4  ;;  %s327_s18 = smov [#allocation4]   ;;  %s31_s17 = int_to_ptr.hbm [resolvable:$true] %s30_s17 }
   0x2   :  { %s32_s19 = sshll.u32 %s327_s18, 4  ;;  %s17_s22 = sshll.u32 %s378_s1, 4  ;;  %s33_s19 = int_to_ptr.vmem [resolvable:$true] %s32_s19  ;;  %s18_s22 = int_to_ptr.hbm [resolvable:$true] %s17_s22 }
   0x3   :  { %s328_s23 = smov 256   ;;  %s329_s24 = smov 16  }
   0x4   :  { %38 = dma.hbm_to_vmem [thread:$0]  %s31_s17, 768, %s33_s19, [#allocation5], %s328_s23, %s328_s23, %s329_s24  }
   0x5   :  { %s330_s25 = smov [#allocation2]   ;;  %s331_s27 = smov 128  }
   0x6   :  { %s19_s26 = sshll.u32 %s330_s25, 4  ;;  %s332_s28 = smov 8   ;;  %s20_s26 = int_to_ptr.vmem [resolvable:$true] %s19_s26 }
   0x7   :  { %25 = dma.hbm_to_vmem [thread:$0]  %s18_s22, 384, %s20_s26, [#allocation3], %s331_s27, %s331_s27, %s332_s28  }
   0x8   :  { %s43_s30 = sshll.u32 %s380_s3, 4  ;;  %s333_s5 = smov [#allocation6]   ;;  %s44_s30 = int_to_ptr.hbm [resolvable:$true] %s43_s30 }
   0x9   :  { %s45_s6 = sshll.u32 %s333_s5, 4  ;;  %s46_s6 = int_to_ptr.vmem [resolvable:$true] %s45_s6 }
   0xa   :  { %51 = dma.hbm_to_vmem [thread:$0]  %s44_s30, 2944, %s46_s6, [#allocation5], %s331_s27, %s331_s27, %s332_s28  }
   0xb   :  { %323 = dma.done.wait [#allocation3], 384  }
   0xc   :  { %324 = vsyncadd [#allocation3], 4294966912 }
   0xd   :  { %325 = dma.done.wait [#allocation5], 3712  }
   0xe   :  { %326 = vsyncadd [#allocation5], 4294963584  ;;  %vm72_vm0 = vcmask 1040384   ;;  %vm107_vm1 = vcmask 1044480   ;;  %v67_v0 = vld [vmem:[#allocation2 + $0x10] sm:$0x1] }
   0xf   :  { %v66_v1 = vld [vmem:[#allocation2 + $0x8] sm:$0xff]  ;;  %234 = vmatpush.msk.msra.mxu0 %vm72_vm0, %v67_v0  ;;  %v101_v2 = vld [vmem:[#allocation4 + $0x20] sm:$0x1f]  ;;  %v102_v3 = vld [vmem:[#allocation4 + $0x28] sm:$0x1f]  ;;  %vm68_vm2 = vcmask 138240  }
  0x10   :  { %v65_v4 = vld [vmem:[#allocation2] sm:$0xff]  ;;  %236 = vmatpush.msk.msra.mxu1 %vm107_vm1, %v101_v2  ;;  %238 = vmatpush.msk.msra.mxu2 %vm107_vm1, %v102_v3  ;;  %v99_v6 = vld [vmem:[#allocation4 + $0x10] sm:$0xff]  ;;  %v100_v7 = vld [vmem:[#allocation4 + $0x18] sm:$0xff]  ;;  %vm103_vm3 = vcmask 171008   ;;  %vm179_vm4 = vcmask 433152  }
  0x11   :  { %90 = vmatpush.msra.mxu0 %v66_v1  ;;  %v64_v5 = vld [vmem:[%s377_s0] sm:$0xff]  ;;  %v97_v8 = vld [vmem:[#allocation4] sm:$0xff]  ;;  %v169_v12 = vld [vmem:[#allocation6 + $0x68] sm:$0xff] }
  0x12   :  { %128 = vmatpush.msra.mxu1 %v99_v6  ;;  %148 = vmatpush.msra.mxu2 %v100_v7  ;;  %v98_v9 = vld [vmem:[#allocation4 + $0x8] sm:$0xff]  ;;  %v170_v11 = vld [vmem:[#allocation6 + $0x70] sm:$0xff]  ;;  %v168_v13 = vld [vmem:[#allocation6 + $0x60] sm:$0xff] }
  0x13   :  { %91 = vmatpush.msra.mxu0 %v65_v4  ;;  %v171_v10 = vld [vmem:[#allocation6 + $0x78] sm:$0xff]  ;;  %v178_v14 = vld [vmem:[#allocation6 + $0xb0] sm:$0x1f]  ;;  %v177_v15 = vld [vmem:[#allocation6 + $0xa8] sm:$0xff] }
  0x14   :  { %235 = vmatmul.msk.f32.vlgmr.msra.gmra.mxu0 %vm68_vm2, %v64_v5  ;;  %129 = vmatpush.msra.mxu1 %v97_v8  ;;  %v167_v16 = vld [vmem:[#allocation6 + $0x58] sm:$0xff]  ;;  %v166_v17 = vld [vmem:[#allocation6 + $0x50] sm:$0xff]  ;;  %v165_v18 = vld [vmem:[#allocation6 + $0x48] sm:$0xff] }
  0x15   :  { %149 = vmatpush.msra.mxu2 %v98_v9  ;;  %186 = vmatpush.msra.mxu3 %v171_v10  ;;  %v164_v19 = vld [vmem:[#allocation6 + $0x40] sm:$0xff]  ;;  %v163_v20 = vld [vmem:[#allocation6 + $0x38] sm:$0xff]  ;;  %v162_v21 = vld [vmem:[#allocation6 + $0x30] sm:$0xff] }
  0x16   :  { %240 = vmatpush.msk.msrb.mxu0 %vm107_vm1, %v178_v14  ;;  %v161_v22 = vld [vmem:[#allocation6 + $0x28] sm:$0xff]  ;;  %v160_v23 = vld [vmem:[#allocation6 + $0x20] sm:$0xff]  ;;  %v159_v24 = vld [vmem:[#allocation6 + $0x18] sm:$0xff] }
  0x17   :  { %187 = vmatpush.msra.mxu3 %v170_v11  ;;  %v158_v25 = vld [vmem:[#allocation6 + $0x10] sm:$0xff]  ;;  %v157_v28 = vld [vmem:[#allocation6 + $0x8] sm:$0xff]  ;;  %v176_v29 = vld [vmem:[#allocation6 + $0xa0] sm:$0xff] }
  0x18   :  { %216 = vmatpush.msrb.mxu0 %v177_v15  ;;  %v156_v30 = vld [vmem:[#allocation6] sm:$0xff]  ;;  %v175_v31 = vld [vmem:[#allocation6 + $0x98] sm:$0xff]  ;;  %v174_v32 = vld [vmem:[#allocation6 + $0x90] sm:$0xff] }
  0x19   :  { %188 = vmatpush.msra.mxu3 %v169_v12  ;;  %v173_v33 = vld [vmem:[#allocation6 + $0x88] sm:$0xff]  ;;  %v172_v34 = vld [vmem:[#allocation6 + $0x80] sm:$0xff] }
  0x1a   :  { %217 = vmatpush.msrb.mxu0 %v176_v29 }
  0x1b   :  { %189 = vmatpush.msra.mxu3 %v168_v13 }
  0x1c   :  { %218 = vmatpush.msrb.mxu0 %v175_v31 }
  0x1d   :  { %190 = vmatpush.msra.mxu3 %v167_v16 }
  0x1e   :  { %219 = vmatpush.msrb.mxu0 %v174_v32 }
  0x1f   :  { %191 = vmatpush.msra.mxu3 %v166_v17 }
  0x20   :  { %220 = vmatpush.msrb.mxu0 %v173_v33 }
  0x21   :  { %192 = vmatpush.msra.mxu3 %v165_v18 }
  0x22   :  { %221 = vmatpush.msrb.mxu0 %v172_v34 }
  0x23   :  { %193 = vmatpush.msra.mxu3 %v164_v19 }
  0x25   :  { %194 = vmatpush.msra.mxu3 %v163_v20 }
  0x27   :  { %195 = vmatpush.msra.mxu3 %v162_v21 }
  0x29   :  { %196 = vmatpush.msra.mxu3 %v161_v22 }
  0x2b   :  { %197 = vmatpush.msra.mxu3 %v160_v23 }
  0x2d   :  { %198 = vmatpush.msra.mxu3 %v159_v24 }
  0x2f   :  { %199 = vmatpush.msra.mxu3 %v158_v25 }
  0x31   :  { %200 = vmatpush.msra.mxu3 %v157_v28 }
  0x33   :  { %201 = vmatpush.msra.mxu3 %v156_v30 }
  0x91   :  { %v93_v26 = vpop.f32.mrf.mxu0 }
  0x92   :  { %v96_v27 = vmax.f32 %v93_v26, 0.0 }
  0x94   :  { %237 = vmatmul.msk.f32.vlgmr.msra.gmra.mxu1 %vm103_vm3, %v96_v27  ;;  %239 = vmatmul.msk.f32.vlgmr.msra.gmra.mxu2 %vm103_vm3, %v96_v27 }
 0x111   :  { %v131_v35 = vpop.f32.mrf.mxu1 }
 0x112   :  { %v154_v36 = vmax.f32 %v131_v35, 0.0 }
 0x114   :  { %202 = vmatmul.f32.vlgmr.msra.gmra.mxu3 %v154_v36 }
 0x117   :  { %v151_v37 = vpop.f32.mrf.mxu2 }
 0x118   :  { %v155_v38 = vmax.f32 %v151_v37, 0.0 }
 0x11a   :  { %241 = vmatmul.msk.f32.vlgmr.msrb.gmra.mxu0 %vm179_vm4, %v155_v38 }
 0x197   :  { %v203_v39 = vpop.f32.mrf.mxu3  ;;  %v223_v40 = vpop.f32.mrf.mxu0 }
 0x198   :  { %v224_v41 = vadd.f32 %v223_v40, %v203_v39 }
 0x19a   :  { %249 = vtanh.f32 %v224_v41 }
 0x1a0   :  { %v250_v42 = vpop.eup %249 }
 0x1a1   :  { %227 = vst [vmem:[%s381_s4] sm:$0xff] %v250_v42 }
 0x1a2   :  { %232 = vsyncpa [#allocation3], 1 }
 0x1a3   :  { %233 = vsyncpa [#allocation5], 1 }

</bundles_post_ra>
